<compile_context>
chip_gen: v5e
topology: v5e:2x2
jax: 0.10.0
libtpu: 0.0.40
codegen_flags: <defaults>
</compile_context>

<pallas_src>
import math
from functools import partial

import jax
import jax.numpy as jnp
from jax.experimental import pallas as pl
from jax.experimental.pallas import tpu as pltpu

BN_EPS = 1e-5
LANE = 128              # feature dims padded to multiples of this (lane width)
FUSED_MAX_BATCH = 512   # single fused kernel when the whole batch is one tile
MAX_BATCH_TILE = 256    # rows per grid step on the tiled (large-batch) path


# --------------------------------------------------------------------------
# Small helpers
# --------------------------------------------------------------------------
def _rup(n, m=LANE):
    return ((n + m - 1) // m) * m


def _pad_axis(a, target, axis):
    pad = target - a.shape[axis]
    if pad == 0:
        return a
    widths = [(0, 0)] * a.ndim
    widths[axis] = (0, pad)
    return jnp.pad(a, widths)


def _pad2(a, rows, cols):
    return _pad_axis(_pad_axis(a, rows, 0), cols, 1)


def _vmem_limit(block_defs):
    """Scoped-VMEM limit from the per-step tile footprint (v7x-safe cap)."""
    total = sum(math.prod(s) * jnp.dtype(d).itemsize for s, d in block_defs)
    need = 2 * total + (4 << 20)          # double-buffering + headroom
    return int(min(max(need, 32 << 20), 64 << 20))


def _cost(flops, transcendentals, block_defs, steps=1):
    byts = steps * sum(math.prod(s) * jnp.dtype(d).itemsize
                       for s, d in block_defs)
    return pl.CostEstimate(flops=int(flops),
                           transcendentals=int(transcendentals),
                           bytes_accessed=int(byts))


def _pick_batch_tile(B):
    """Largest tile <= MAX_BATCH_TILE dividing B, multiple of 16 (bf16 sublane
    packing of the inter-stage activations), leaving >= 2 tiles (megacore)."""
    cap = min(MAX_BATCH_TILE, B // 2)
    cap -= cap % 16
    for tb in range(cap, 15, -16):
        if B % tb == 0:
            return tb
    return None  # fall back to the fused single-tile path


# --------------------------------------------------------------------------
# Kernels
# --------------------------------------------------------------------------
def _fused_kernel(inv_t_ref, x_ref, ew1_ref, eg_ref, ebt_ref,
                  ew2_ref, eb2_ref, noise_ref,
                  dw1_ref, dg_ref, dbt_ref, dw2_ref, db2_ref,
                  recon_ref, mu_ref):
    """Whole forward in one kernel (batch == one tile => BN stats are local)."""
    # Encoder Linear1 (bias dropped: it cancels in training-mode BN) + BN + ReLU.
    a = jnp.dot(x_ref[...].astype(jnp.bfloat16), ew1_ref[...],
                preferred_element_type=jnp.float32)
    mean = jnp.mean(a, axis=0, keepdims=True)
    c = a - mean
    var = jnp.mean(c * c, axis=0, keepdims=True)          # two-pass (stable)
    h = jnp.maximum(c * (eg_ref[...] * jax.lax.rsqrt(var + BN_EPS))
                    + ebt_ref[...], 0.0)

    # Encoder Linear2 -> logits; mu = q_z.probs = sigmoid(logits).
    logits = jnp.dot(h.astype(jnp.bfloat16), ew2_ref[...],
                     preferred_element_type=jnp.float32) + eb2_ref[...]
    mu_ref[...] = jax.nn.sigmoid(logits)

    # RelaxedBernoulli(T, logits).rsample(): noise = logit(u) precomputed,
    # divide replaced by multiply with 1/T (SMEM scalar).
    z = jax.nn.sigmoid((logits + noise_ref[...]) * inv_t_ref[0])

    # Decoder Linear1 (bias cancels in BN) + BN + ReLU.
    d = jnp.dot(z.astype(jnp.bfloat16), dw1_ref[...],
                preferred_element_type=jnp.float32)
    dmean = jnp.mean(d, axis=0, keepdims=True)
    dc = d - dmean
    dvar = jnp.mean(dc * dc, axis=0, keepdims=True)
    hd = jnp.maximum(dc * (dg_ref[...] * jax.lax.rsqrt(dvar + BN_EPS))
                     + dbt_ref[...], 0.0)

    # Decoder Linear2 + Sigmoid.
    out = jnp.dot(hd.astype(jnp.bfloat16), dw2_ref[...],
                  preferred_element_type=jnp.float32) + db2_ref[...]
    recon_ref[...] = jax.nn.sigmoid(out)


def _enc_head_kernel(x_ref, ew1_ref, a1_ref, mean_ref, m2_ref):
    """a1 = x @ W1 (bf16 out) + per-tile mean / M2 (Chan-combinable stats)."""
    a = jnp.dot(x_ref[...].astype(jnp.bfloat16), ew1_ref[...],
                preferred_element_type=jnp.float32)
    a1_ref[...] = a.astype(a1_ref.dtype)                   # bf16 inter-stage
    mean = jnp.mean(a, axis=0, keepdims=True)
    c = a - mean
    mean_ref[...] = mean[None]
    m2_ref[...] = jnp.sum(c * c, axis=0, keepdims=True)[None]


def _enc_tail_sample_dec_head_kernel(inv_t_ref, a1_ref, sc1_ref, sh1_ref,
                                     ew2_ref, eb2_ref, noise_ref, dw1_ref,
                                     mu_ref, d1_ref, dmean_ref, dm2_ref):
    """Encoder BN+ReLU+Linear2, rsample, decoder Linear1 + per-tile stats."""
    h = jnp.maximum(a1_ref[...].astype(jnp.float32) * sc1_ref[...]
                    + sh1_ref[...], 0.0)
    logits = jnp.dot(h.astype(jnp.bfloat16), ew2_ref[...],
                     preferred_element_type=jnp.float32) + eb2_ref[...]
    mu_ref[...] = jax.nn.sigmoid(logits)
    z = jax.nn.sigmoid((logits + noise_ref[...]) * inv_t_ref[0])
    d = jnp.dot(z.astype(jnp.bfloat16), dw1_ref[...],
                preferred_element_type=jnp.float32)
    d1_ref[...] = d.astype(d1_ref.dtype)                   # bf16 inter-stage
    dmean = jnp.mean(d, axis=0, keepdims=True)
    dc = d - dmean
    dmean_ref[...] = dmean[None]
    dm2_ref[...] = jnp.sum(dc * dc, axis=0, keepdims=True)[None]


def _dec_tail_kernel(d1_ref, sc2_ref, sh2_ref, dw2_ref, db2_ref, recon_ref):
    """Decoder BN+ReLU+Linear2+Sigmoid."""
    hd = jnp.maximum(d1_ref[...].astype(jnp.float32) * sc2_ref[...]
                     + sh2_ref[...], 0.0)
    out = jnp.dot(hd.astype(jnp.bfloat16), dw2_ref[...],
                  preferred_element_type=jnp.float32) + db2_ref[...]
    recon_ref[...] = jax.nn.sigmoid(out)


# --------------------------------------------------------------------------
# XLA glue (tiled path only): Chan's parallel-variance combine -> BN affine
# --------------------------------------------------------------------------
def _bn_affine_from_tiles(means, m2s, tile_rows, total_rows, gamma, beta):
    means = means[:, 0, :]                                 # (nbt, H)
    m2s = m2s[:, 0, :]
    mean = jnp.mean(means, axis=0, keepdims=True)
    m2 = (jnp.sum(m2s, axis=0, keepdims=True)
          + tile_rows * jnp.sum((means - mean) ** 2, axis=0, keepdims=True))
    var = m2 / total_rows                                  # biased batch var
    scale = gamma * jax.lax.rsqrt(var + BN_EPS)
    shift = beta - mean * scale
    return scale, shift


# --------------------------------------------------------------------------
# Forward paths
# --------------------------------------------------------------------------
def _forward_fused(inv_t, x, ew1, eg, ebt, ew2, eb2, noise,
                   dw1, dg, dbt, dw2, db2):
    B, Dp = x.shape
    H1p, Lp, H2p, Dop = ew1.shape[1], ew2.shape[1], dw1.shape[1], dw2.shape[1]

    blocks = [((B, Dp), jnp.float32), ((Dp, H1p), jnp.bfloat16),
              ((1, H1p), jnp.float32), ((1, H1p), jnp.float32),
              ((H1p, Lp), jnp.bfloat16), ((1, Lp), jnp.float32),
              ((B, Lp), jnp.float32), ((Lp, H2p), jnp.bfloat16),
              ((1, H2p), jnp.float32), ((1, H2p), jnp.float32),
              ((H2p, Dop), jnp.bfloat16), ((1, Dop), jnp.float32),
              ((B, Dop), jnp.float32), ((B, Lp), jnp.float32)]
    flops = 2 * B * (Dp * H1p + H1p * Lp + Lp * H2p + H2p * Dop)
    transc = B * (2 * Lp + Dop)

    def full(shape):
        nd = len(shape)
        return pl.BlockSpec(shape, lambda i, _nd=nd: (0,) * _nd)

    recon, mu = pl.pallas_call(
        _fused_kernel,
        grid=(1,),
        in_specs=[pl.BlockSpec(memory_space=pltpu.MemorySpace.SMEM),
                  full((B, Dp)), full((Dp, H1p)), full((1, H1p)), full((1, H1p)),
                  full((H1p, Lp)), full((1, Lp)), full((B, Lp)),
                  full((Lp, H2p)), full((1, H2p)), full((1, H2p)),
                  full((H2p, Dop)), full((1, Dop))],
        out_specs=(full((B, Dop)), full((B, Lp))),
        out_shape=(jax.ShapeDtypeStruct((B, Dop), jnp.float32),
                   jax.ShapeDtypeStruct((B, Lp), jnp.float32)),
        compiler_params=pltpu.CompilerParams(
            dimension_semantics=("arbitrary",),
            vmem_limit_bytes=_vmem_limit(blocks)),
        cost_estimate=_cost(flops, transc, blocks),
    )(inv_t, x, ew1, eg, ebt, ew2, eb2, noise, dw1, dg, dbt, dw2, db2)
    return recon, mu


def _forward_tiled(inv_t, x, ew1, eg, ebt, ew2, eb2, noise,
                   dw1, dg, dbt, dw2, db2, tb):
    B, Dp = x.shape
    H1p, Lp, H2p, Dop = ew1.shape[1], ew2.shape[1], dw1.shape[1], dw2.shape[1]
    nbt = B // tb

    rows = lambda d: pl.BlockSpec((tb, d), lambda i: (i, 0))
    full = lambda r, c: pl.BlockSpec((r, c), lambda i: (0, 0))
    stat = lambda h: pl.BlockSpec((1, 1, h), lambda i: (i, 0, 0))
    smem = pl.BlockSpec(memory_space=pltpu.MemorySpace.SMEM)
    params_for = lambda blocks: pltpu.CompilerParams(
        dimension_semantics=("parallel",),
        vmem_limit_bytes=_vmem_limit(blocks))

    # ---- K1: encoder Linear1 + per-tile BN statistics ---------------------
    k1_blocks = [((tb, Dp), jnp.float32), ((Dp, H1p), jnp.bfloat16),
                 ((tb, H1p), jnp.bfloat16),
                 ((1, 1, H1p), jnp.float32), ((1, 1, H1p), jnp.float32)]
    a1, e_mean, e_m2 = pl.pallas_call(
        _enc_head_kernel,
        grid=(nbt,),
        in_specs=[rows(Dp), full(Dp, H1p)],
        out_specs=(rows(H1p), stat(H1p), stat(H1p)),
        out_shape=(jax.ShapeDtypeStruct((B, H1p), jnp.bfloat16),
                   jax.ShapeDtypeStruct((nbt, 1, H1p), jnp.float32),
                   jax.ShapeDtypeStruct((nbt, 1, H1p), jnp.float32)),
        compiler_params=params_for(k1_blocks),
        cost_estimate=_cost(2 * B * Dp * H1p, 0, k1_blocks, steps=nbt),
    )(x, ew1)

    sc1, sh1 = _bn_affine_from_tiles(e_mean, e_m2, float(tb), float(B), eg, ebt)

    # ---- K2: encoder tail + sampling + decoder Linear1 + statistics -------
    k2_blocks = [((tb, H1p), jnp.bfloat16), ((1, H1p), jnp.float32),
                 ((1, H1p), jnp.float32), ((H1p, Lp), jnp.bfloat16),
                 ((1, Lp), jnp.float32), ((tb, Lp), jnp.float32),
                 ((Lp, H2p), jnp.bfloat16),
                 ((tb, Lp), jnp.float32), ((tb, H2p), jnp.bfloat16),
                 ((1, 1, H2p), jnp.float32), ((1, 1, H2p), jnp.float32)]
    mu, d1, d_mean, d_m2 = pl.pallas_call(
        _enc_tail_sample_dec_head_kernel,
        grid=(nbt,),
        in_specs=[smem, rows(H1p), full(1, H1p), full(1, H1p),
                  full(H1p, Lp), full(1, Lp), rows(Lp), full(Lp, H2p)],
        out_specs=(rows(Lp), rows(H2p), stat(H2p), stat(H2p)),
        out_shape=(jax.ShapeDtypeStruct((B, Lp), jnp.float32),
                   jax.ShapeDtypeStruct((B, H2p), jnp.bfloat16),
                   jax.ShapeDtypeStruct((nbt, 1, H2p), jnp.float32),
                   jax.ShapeDtypeStruct((nbt, 1, H2p), jnp.float32)),
        compiler_params=params_for(k2_blocks),
        cost_estimate=_cost(2 * B * (H1p * Lp + Lp * H2p), 2 * B * Lp,
                            k2_blocks, steps=nbt),
    )(inv_t, a1, sc1, sh1, ew2, eb2, noise, dw1)

    sc2, sh2 = _bn_affine_from_tiles(d_mean, d_m2, float(tb), float(B), dg, dbt)

    # ---- K3: decoder tail --------------------------------------------------
    k3_blocks = [((tb, H2p), jnp.bfloat16), ((1, H2p), jnp.float32),
                 ((1, H2p), jnp.float32), ((H2p, Dop), jnp.bfloat16),
                 ((1, Dop), jnp.float32), ((tb, Dop), jnp.float32)]
    recon = pl.pallas_call(
        _dec_tail_kernel,
        grid=(nbt,),
        in_specs=[rows(H2p), full(1, H2p), full(1, H2p),
                  full(H2p, Dop), full(1, Dop)],
        out_specs=rows(Dop),
        out_shape=jax.ShapeDtypeStruct((B, Dop), jnp.float32),
        compiler_params=params_for(k3_blocks),
        cost_estimate=_cost(2 * B * H2p * Dop, B * Dop, k3_blocks, steps=nbt),
    )(d1, sc2, sh2, dw2, db2)

    return recon, mu


# --------------------------------------------------------------------------
# Wrapper
# --------------------------------------------------------------------------
@partial(jax.jit, static_argnames=("batch_tile",))
def relaxed_cat_ae_forward(x, u, temperature, params, batch_tile=None):
    (ew1, eb1, eg, ebt, ew2, eb2, dw1, db1, dg, dbt, dw2, db2) = params
    # A Linear bias immediately followed by training-mode BatchNorm cancels
    # exactly, so eb1/db1 do not affect the forward.
    del eb1, db1

    B, D_in = x.shape
    H1, L, H2, D_out = ew1.shape[1], ew2.shape[1], dw1.shape[1], dw2.shape[1]

    # Lane-dense / MXU-friendly zero-padding of every feature dim.  Zero
    # gamma/beta padding keeps padded columns exactly zero through BN+ReLU.
    Dp, H1p, Lp, H2p, Dop = (_rup(d) for d in (D_in, H1, L, H2, D_out))

    xp = _pad_axis(x.astype(jnp.float32), Dp, 1)
    ew1p = _pad2(ew1, Dp, H1p).astype(jnp.bfloat16)
    egp, ebtp = _pad_axis(eg, H1p, 1), _pad_axis(ebt, H1p, 1)
    ew2p = _pad2(ew2, H1p, Lp).astype(jnp.bfloat16)
    eb2p = _pad_axis(eb2, Lp, 1)
    dw1p = _pad2(dw1, Lp, H2p).astype(jnp.bfloat16)
    dgp, dbtp = _pad_axis(dg, H2p, 1), _pad_axis(dbt, H2p, 1)
    dw2p = _pad2(dw2, H2p, Dop).astype(jnp.bfloat16)
    db2p = _pad_axis(db2, Dop, 1)

    # RelaxedBernoulli logistic noise logit(u), clamped away from {0,1};
    # computed here so it fuses with the uniform-RNG producer.
    u_c = jnp.clip(u.astype(jnp.float32), 1e-6, 1.0 - 1e-6)
    noise = _pad_axis(jnp.log(u_c) - jnp.log1p(-u_c), Lp, 1)

    inv_t = (1.0 / jnp.asarray(temperature, jnp.float32)).reshape((1,))

    if batch_tile is None and B > FUSED_MAX_BATCH:
        batch_tile = _pick_batch_tile(B)

    if batch_tile is None:
        recon_p, mu_p = _forward_fused(inv_t, xp, ew1p, egp, ebtp, ew2p, eb2p,
                                       noise, dw1p, dgp, dbtp, dw2p, db2p)
    else:
        assert B % batch_tile == 0 and batch_tile % 16 == 0, \
            "batch_tile must divide the batch and be a multiple of 16"
        recon_p, mu_p = _forward_tiled(inv_t, xp, ew1p, egp, ebtp, ew2p, eb2p,
                                       noise, dw1p, dgp, dbtp, dw2p, db2p,
                                       batch_tile)

    return recon_p[:, :D_out], mu_p[:, :L]


# --------------------------------------------------------------------------
# Parameters & reference
# --------------------------------------------------------------------------
def init_params(key, enc_h, dec_h):
    """Deterministic synthetic parameters (kaiming-uniform-ish for Linear)."""
    def linear(key, fan_in, fan_out):
        kw, kb = jax.random.split(key)
        bound = 1.0 / jnp.sqrt(float(fan_in))
        w = jax.random.uniform(kw, (fan_in, fan_out), jnp.float32, -bound, bound)
        b = jax.random.uniform(kb, (1, fan_out), jnp.float32, -bound, bound)
        return w, b

    keys = jax.random.split(key, 8)
    ew1, eb1 = linear(keys[0], enc_h[0], enc_h[1])
    eg = 1.0 + 0.1 * jax.random.normal(keys[1], (1, enc_h[1]), jnp.float32)
    ebt = 0.1 * jax.random.normal(keys[2], (1, enc_h[1]), jnp.float32)
    ew2, eb2 = linear(keys[3], enc_h[1], enc_h[2])
    dw1, db1 = linear(keys[4], dec_h[0], dec_h[1])
    dg = 1.0 + 0.1 * jax.random.normal(keys[5], (1, dec_h[1]), jnp.float32)
    dbt = 0.1 * jax.random.normal(keys[6], (1, dec_h[1]), jnp.float32)
    dw2, db2 = linear(keys[7], dec_h[1], dec_h[2])
    return (ew1, eb1, eg, ebt, ew2, eb2, dw1, db1, dg, dbt, dw2, db2)


def reference_forward(x, u, temperature, params, matmul_dtype=jnp.float32):
    """Pure-JAX reference mirroring the PyTorch forward.

    matmul_dtype=jnp.bfloat16 mirrors the kernel's bf16-operand / f32-accumulate
    matmuls; jnp.float32 is the faithful PyTorch (f32) numerics.
    """
    (ew1, eb1, eg, ebt, ew2, eb2, dw1, db1, dg, dbt, dw2, db2) = params

    def mm(a, w):
        return jnp.dot(a.astype(matmul_dtype), w.astype(matmul_dtype),
                       preferred_element_type=jnp.float32)

    def bn(h, gamma, beta):
        mean = jnp.mean(h, axis=0, keepdims=True)
        var = jnp.mean((h - mean) ** 2, axis=0, keepdims=True)
        return (h - mean) * jax.lax.rsqrt(var + BN_EPS) * gamma + beta

    u_c = jnp.clip(u, 1e-6, 1.0 - 1e-6)
    noise = jnp.log(u_c) - jnp.log1p(-u_c)

    h = mm(x, ew1) + eb1
    h = jnp.maximum(bn(h, eg, ebt), 0.0)
    logits = mm(h, ew2) + eb2
    mu = jax.nn.sigmoid(logits)
    z = jax.nn.sigmoid((logits + noise) / temperature)
    d = mm(z, dw1) + db1
    d = jnp.maximum(bn(d, dg, dbt), 0.0)
    recon = jax.nn.sigmoid(mm(d, dw2) + db2)
    return recon, mu


# --------------------------------------------------------------------------
if __name__ == "__main__":
    # Small shapes consistent with the module (enc_h/dec_h include start & end).
    enc_h = [32, 64, 16]          # data_dim -> hidden -> latent
    dec_h = [16, 64, 32]          # latent -> hidden -> data_dim
    batch = 8
    temperature = 0.5

    key = jax.random.PRNGKey(0)
    k_param, k_x, k_u, k_x2, k_u2 = jax.random.split(key, 5)

    params = init_params(k_param, enc_h, dec_h)
    x = jax.random.uniform(k_x, (batch, enc_h[0]), jnp.float32)
    u = jax.random.uniform(k_u, (batch, enc_h[-1]), jnp.float32,
                           minval=1e-6, maxval=1.0 - 1e-6)

    # ---- Fused single-kernel path (default for small/medium batch) --------
    recon, mu = relaxed_cat_ae_forward(x, u, temperature, params)
    recon, mu = jax.block_until_ready((recon, mu))
    assert recon.shape == (batch, dec_h[-1]) and mu.shape == (batch, enc_h[-1])

    # Tight check against a reference that mirrors the kernel's bf16 matmuls.
    recon_m, mu_m = reference_forward(x, u, temperature, params,
                                      matmul_dtype=jnp.bfloat16)
    assert jnp.allclose(recon, recon_m, atol=2e-3, rtol=2e-3)
    assert jnp.allclose(mu, mu_m, atol=2e-3, rtol=2e-3)

    # Loose sanity check against the faithful f32 reference.
    recon_f, mu_f = reference_forward(x, u, temperature, params)
    assert jnp.allclose(recon, recon_f, atol=5e-2)
    assert jnp.allclose(mu, mu_f, atol=5e-2)

    # ---- Batch-tiled 3-kernel path (forced small tile to exercise it) -----
    batch2 = 32
    x2 = jax.random.uniform(k_x2, (batch2, enc_h[0]), jnp.float32)
    u2 = jax.random.uniform(k_u2, (batch2, enc_h[-1]), jnp.float32,
                            minval=1e-6, maxval=1.0 - 1e-6)
    recon2, mu2 = relaxed_cat_ae_forward(x2, u2, temperature, params,
                                         batch_tile=16)
    recon2, mu2 = jax.block_until_ready((recon2, mu2))
    assert recon2.shape == (batch2, dec_h[-1]) and mu2.shape == (batch2, enc_h[-1])
    recon2_f, mu2_f = reference_forward(x2, u2, temperature, params)
    assert jnp.allclose(recon2, recon2_f, atol=5e-2)
    assert jnp.allclose(mu2, mu2_f, atol=5e-2)

    print("KERNEL_OK")
</pallas_src>

<mosaic_0001>
module attributes {stable_mosaic.version = 11 : i64} {
  func.func @_fused_kernel(%arg0: i32, %arg1: memref<1xf32, #tpu.memory_space<smem>>, %arg2: memref<8x128xf32, #tpu.memory_space<vmem>>, %arg3: memref<128x128xbf16, #tpu.memory_space<vmem>>, %arg4: memref<1x128xf32, #tpu.memory_space<vmem>>, %arg5: memref<1x128xf32, #tpu.memory_space<vmem>>, %arg6: memref<128x128xbf16, #tpu.memory_space<vmem>>, %arg7: memref<1x128xf32, #tpu.memory_space<vmem>>, %arg8: memref<8x128xf32, #tpu.memory_space<vmem>>, %arg9: memref<128x128xbf16, #tpu.memory_space<vmem>>, %arg10: memref<1x128xf32, #tpu.memory_space<vmem>>, %arg11: memref<1x128xf32, #tpu.memory_space<vmem>>, %arg12: memref<128x128xbf16, #tpu.memory_space<vmem>>, %arg13: memref<1x128xf32, #tpu.memory_space<vmem>>, %arg14: memref<8x128xf32, #tpu.memory_space<vmem>>, %arg15: memref<8x128xf32, #tpu.memory_space<vmem>>) attributes {dimension_semantics = [#tpu.dimension_semantics<arbitrary>], iteration_bounds = array<i64: 1>, scalar_prefetch = 0 : i64, scratch_operands = 0 : i64, tpu.core_type = #tpu.core_type<tc>, window_params = [{transform_indices = @transform_0, window_bounds = array<i64: 1>}, {pipeline_mode = #tpu.pipeline_mode<synchronous>, transform_indices = @transform_1, window_bounds = array<i64: 8, 128>}, {pipeline_mode = #tpu.pipeline_mode<synchronous>, transform_indices = @transform_2, window_bounds = array<i64: 128, 128>}, {pipeline_mode = #tpu.pipeline_mode<synchronous>, transform_indices = @transform_3, window_bounds = array<i64: 1, 128>}, {pipeline_mode = #tpu.pipeline_mode<synchronous>, transform_indices = @transform_4, window_bounds = array<i64: 1, 128>}, {pipeline_mode = #tpu.pipeline_mode<synchronous>, transform_indices = @transform_5, window_bounds = array<i64: 128, 128>}, {pipeline_mode = #tpu.pipeline_mode<synchronous>, transform_indices = @transform_6, window_bounds = array<i64: 1, 128>}, {pipeline_mode = #tpu.pipeline_mode<synchronous>, transform_indices = @transform_7, window_bounds = array<i64: 8, 128>}, {pipeline_mode = #tpu.pipeline_mode<synchronous>, transform_indices = @transform_8, window_bounds = array<i64: 128, 128>}, {pipeline_mode = #tpu.pipeline_mode<synchronous>, transform_indices = @transform_9, window_bounds = array<i64: 1, 128>}, {pipeline_mode = #tpu.pipeline_mode<synchronous>, transform_indices = @transform_10, window_bounds = array<i64: 1, 128>}, {pipeline_mode = #tpu.pipeline_mode<synchronous>, transform_indices = @transform_11, window_bounds = array<i64: 128, 128>}, {pipeline_mode = #tpu.pipeline_mode<synchronous>, transform_indices = @transform_12, window_bounds = array<i64: 1, 128>}, {pipeline_mode = #tpu.pipeline_mode<synchronous>, transform_indices = @transform_13, window_bounds = array<i64: 8, 128>}, {pipeline_mode = #tpu.pipeline_mode<synchronous>, transform_indices = @transform_14, window_bounds = array<i64: 8, 128>}]} {
    %c0 = arith.constant 0 : index
    %c0_0 = arith.constant 0 : index
    %0 = vector.load %arg2[%c0, %c0_0] : memref<8x128xf32, #tpu.memory_space<vmem>>, vector<8x128xf32>
    %1 = arith.truncf %0 : vector<8x128xf32> to vector<8x128xbf16>
    %c0_1 = arith.constant 0 : index
    %c0_2 = arith.constant 0 : index
    %2 = vector.load %arg3[%c0_1, %c0_2] : memref<128x128xbf16, #tpu.memory_space<vmem>>, vector<128x128xbf16>
    %cst = arith.constant dense<0.000000e+00> : vector<8x128xf32>
    %3 = tpu.matmul %1, %2, %cst {dimension_numbers = #tpu.dot_dimension_numbers<[1], [0], [0], [1], [0, 0, 1, 1], [], []>} : vector<8x128xbf16>, vector<128x128xbf16>, vector<8x128xf32> -> vector<8x128xf32>
    %cst_3 = arith.constant dense<0.000000e+00> : vector<128xf32>
    %4 = vector.multi_reduction <add>, %3, %cst_3 [0] : vector<8x128xf32> to vector<128xf32>
    %5 = vector.shape_cast %4 : vector<128xf32> to vector<1x128xf32>
    %cst_4 = arith.constant 8.000000e+00 : f32
    %6 = vector.broadcast %cst_4 : f32 to vector<1x128xf32>
    %7 = arith.divf %5, %6 : vector<1x128xf32>
    %8 = vector.broadcast %7 : vector<1x128xf32> to vector<8x128xf32>
    %9 = arith.subf %3, %8 : vector<8x128xf32>
    %10 = arith.mulf %9, %9 : vector<8x128xf32>
    %cst_5 = arith.constant dense<0.000000e+00> : vector<128xf32>
    %11 = vector.multi_reduction <add>, %10, %cst_5 [0] : vector<8x128xf32> to vector<128xf32>
    %12 = vector.shape_cast %11 : vector<128xf32> to vector<1x128xf32>
    %cst_6 = arith.constant 8.000000e+00 : f32
    %13 = vector.broadcast %cst_6 : f32 to vector<1x128xf32>
    %14 = arith.divf %12, %13 : vector<1x128xf32>
    %c0_7 = arith.constant 0 : index
    %c0_8 = arith.constant 0 : index
    %15 = vector.load %arg4[%c0_7, %c0_8] : memref<1x128xf32, #tpu.memory_space<vmem>>, vector<1x128xf32>
    %cst_9 = arith.constant 9.99999974E-6 : f32
    %16 = vector.broadcast %cst_9 : f32 to vector<1x128xf32>
    %17 = arith.addf %14, %16 : vector<1x128xf32>
    %18 = math.rsqrt %17 : vector<1x128xf32>
    %19 = arith.mulf %15, %18 : vector<1x128xf32>
    %20 = vector.broadcast %19 : vector<1x128xf32> to vector<8x128xf32>
    %21 = arith.mulf %9, %20 : vector<8x128xf32>
    %c0_10 = arith.constant 0 : index
    %c0_11 = arith.constant 0 : index
    %22 = vector.load %arg5[%c0_10, %c0_11] : memref<1x128xf32, #tpu.memory_space<vmem>>, vector<1x128xf32>
    %23 = vector.broadcast %22 : vector<1x128xf32> to vector<8x128xf32>
    %24 = arith.addf %21, %23 : vector<8x128xf32>
    %cst_12 = arith.constant 0.000000e+00 : f32
    %25 = vector.broadcast %cst_12 : f32 to vector<8x128xf32>
    %26 = arith.maximumf %24, %25 : vector<8x128xf32>
    %27 = arith.truncf %26 : vector<8x128xf32> to vector<8x128xbf16>
    %c0_13 = arith.constant 0 : index
    %c0_14 = arith.constant 0 : index
    %28 = vector.load %arg6[%c0_13, %c0_14] : memref<128x128xbf16, #tpu.memory_space<vmem>>, vector<128x128xbf16>
    %cst_15 = arith.constant dense<0.000000e+00> : vector<8x128xf32>
    %29 = tpu.matmul %27, %28, %cst_15 {dimension_numbers = #tpu.dot_dimension_numbers<[1], [0], [0], [1], [0, 0, 1, 1], [], []>} : vector<8x128xbf16>, vector<128x128xbf16>, vector<8x128xf32> -> vector<8x128xf32>
    %c0_16 = arith.constant 0 : index
    %c0_17 = arith.constant 0 : index
    %30 = vector.load %arg7[%c0_16, %c0_17] : memref<1x128xf32, #tpu.memory_space<vmem>>, vector<1x128xf32>
    %31 = vector.broadcast %30 : vector<1x128xf32> to vector<8x128xf32>
    %32 = arith.addf %29, %31 : vector<8x128xf32>
    %33 = arith.negf %32 : vector<8x128xf32>
    %34 = math.exp %33 : vector<8x128xf32>
    %cst_18 = arith.constant 1.000000e+00 : f32
    %35 = vector.broadcast %cst_18 : f32 to vector<8x128xf32>
    %36 = arith.addf %35, %34 : vector<8x128xf32>
    %37 = arith.divf %35, %36 : vector<8x128xf32>
    %c0_19 = arith.constant 0 : index
    %c0_20 = arith.constant 0 : index
    %38 = vector.load %arg15[%c0_19, %c0_20] : memref<8x128xf32, #tpu.memory_space<vmem>>, vector<8x128xf32>
    tpu.vector_store %arg15[%c0_19, %c0_20], %37 {strides = array<i32>} : memref<8x128xf32, #tpu.memory_space<vmem>>, vector<8x128xf32>,
    %c0_21 = arith.constant 0 : index
    %c0_22 = arith.constant 0 : index
    %39 = vector.load %arg8[%c0_21, %c0_22] : memref<8x128xf32, #tpu.memory_space<vmem>>, vector<8x128xf32>
    %40 = arith.addf %32, %39 : vector<8x128xf32>
    %c0_23 = arith.constant 0 : index
    %41 = memref.load %arg1[%c0_23] : memref<1xf32, #tpu.memory_space<smem>>
    %42 = vector.broadcast %41 : f32 to vector<8x128xf32>
    %43 = arith.mulf %40, %42 : vector<8x128xf32>
    %44 = arith.negf %43 : vector<8x128xf32>
    %45 = math.exp %44 : vector<8x128xf32>
    %cst_24 = arith.constant 1.000000e+00 : f32
    %46 = vector.broadcast %cst_24 : f32 to vector<8x128xf32>
    %47 = arith.addf %46, %45 : vector<8x128xf32>
    %48 = arith.divf %46, %47 : vector<8x128xf32>
    %49 = arith.truncf %48 : vector<8x128xf32> to vector<8x128xbf16>
    %c0_25 = arith.constant 0 : index
    %c0_26 = arith.constant 0 : index
    %50 = vector.load %arg9[%c0_25, %c0_26] : memref<128x128xbf16, #tpu.memory_space<vmem>>, vector<128x128xbf16>
    %cst_27 = arith.constant dense<0.000000e+00> : vector<8x128xf32>
    %51 = tpu.matmul %49, %50, %cst_27 {dimension_numbers = #tpu.dot_dimension_numbers<[1], [0], [0], [1], [0, 0, 1, 1], [], []>} : vector<8x128xbf16>, vector<128x128xbf16>, vector<8x128xf32> -> vector<8x128xf32>
    %cst_28 = arith.constant dense<0.000000e+00> : vector<128xf32>
    %52 = vector.multi_reduction <add>, %51, %cst_28 [0] : vector<8x128xf32> to vector<128xf32>
    %53 = vector.shape_cast %52 : vector<128xf32> to vector<1x128xf32>
    %cst_29 = arith.constant 8.000000e+00 : f32
    %54 = vector.broadcast %cst_29 : f32 to vector<1x128xf32>
    %55 = arith.divf %53, %54 : vector<1x128xf32>
    %56 = vector.broadcast %55 : vector<1x128xf32> to vector<8x128xf32>
    %57 = arith.subf %51, %56 : vector<8x128xf32>
    %58 = arith.mulf %57, %57 : vector<8x128xf32>
    %cst_30 = arith.constant dense<0.000000e+00> : vector<128xf32>
    %59 = vector.multi_reduction <add>, %58, %cst_30 [0] : vector<8x128xf32> to vector<128xf32>
    %60 = vector.shape_cast %59 : vector<128xf32> to vector<1x128xf32>
    %cst_31 = arith.constant 8.000000e+00 : f32
    %61 = vector.broadcast %cst_31 : f32 to vector<1x128xf32>
    %62 = arith.divf %60, %61 : vector<1x128xf32>
    %c0_32 = arith.constant 0 : index
    %c0_33 = arith.constant 0 : index
    %63 = vector.load %arg10[%c0_32, %c0_33] : memref<1x128xf32, #tpu.memory_space<vmem>>, vector<1x128xf32>
    %cst_34 = arith.constant 9.99999974E-6 : f32
    %64 = vector.broadcast %cst_34 : f32 to vector<1x128xf32>
    %65 = arith.addf %62, %64 : vector<1x128xf32>
    %66 = math.rsqrt %65 : vector<1x128xf32>
    %67 = arith.mulf %63, %66 : vector<1x128xf32>
    %68 = vector.broadcast %67 : vector<1x128xf32> to vector<8x128xf32>
    %69 = arith.mulf %57, %68 : vector<8x128xf32>
    %c0_35 = arith.constant 0 : index
    %c0_36 = arith.constant 0 : index
    %70 = vector.load %arg11[%c0_35, %c0_36] : memref<1x128xf32, #tpu.memory_space<vmem>>, vector<1x128xf32>
    %71 = vector.broadcast %70 : vector<1x128xf32> to vector<8x128xf32>
    %72 = arith.addf %69, %71 : vector<8x128xf32>
    %cst_37 = arith.constant 0.000000e+00 : f32
    %73 = vector.broadcast %cst_37 : f32 to vector<8x128xf32>
    %74 = arith.maximumf %72, %73 : vector<8x128xf32>
    %75 = arith.truncf %74 : vector<8x128xf32> to vector<8x128xbf16>
    %c0_38 = arith.constant 0 : index
    %c0_39 = arith.constant 0 : index
    %76 = vector.load %arg12[%c0_38, %c0_39] : memref<128x128xbf16, #tpu.memory_space<vmem>>, vector<128x128xbf16>
    %cst_40 = arith.constant dense<0.000000e+00> : vector<8x128xf32>
    %77 = tpu.matmul %75, %76, %cst_40 {dimension_numbers = #tpu.dot_dimension_numbers<[1], [0], [0], [1], [0, 0, 1, 1], [], []>} : vector<8x128xbf16>, vector<128x128xbf16>, vector<8x128xf32> -> vector<8x128xf32>
    %c0_41 = arith.constant 0 : index
    %c0_42 = arith.constant 0 : index
    %78 = vector.load %arg13[%c0_41, %c0_42] : memref<1x128xf32, #tpu.memory_space<vmem>>, vector<1x128xf32>
    %79 = vector.broadcast %78 : vector<1x128xf32> to vector<8x128xf32>
    %80 = arith.addf %77, %79 : vector<8x128xf32>
    %81 = arith.negf %80 : vector<8x128xf32>
    %82 = math.exp %81 : vector<8x128xf32>
    %cst_43 = arith.constant 1.000000e+00 : f32
    %83 = vector.broadcast %cst_43 : f32 to vector<8x128xf32>
    %84 = arith.addf %83, %82 : vector<8x128xf32>
    %85 = arith.divf %83, %84 : vector<8x128xf32>
    %c0_44 = arith.constant 0 : index
    %c0_45 = arith.constant 0 : index
    %86 = vector.load %arg14[%c0_44, %c0_45] : memref<8x128xf32, #tpu.memory_space<vmem>>, vector<8x128xf32>
    tpu.vector_store %arg14[%c0_44, %c0_45], %85 {strides = array<i32>} : memref<8x128xf32, #tpu.memory_space<vmem>>, vector<8x128xf32>,
    return
  }
  func.func @transform_0(%arg0: i32) -> i32 {
    %c0_i32 = arith.constant 0 : i32
    %c0_i32_0 = arith.constant 0 : i32
    return %c0_i32 : i32
  }
  func.func @transform_1(%arg0: i32) -> (i32, i32) {
    %c0_i32 = arith.constant 0 : i32
    %c0_i32_0 = arith.constant 0 : i32
    %c0_i32_1 = arith.constant 0 : i32
    return %c0_i32, %c0_i32_0 : i32, i32
  }
  func.func @transform_2(%arg0: i32) -> (i32, i32) {
    %c0_i32 = arith.constant 0 : i32
    %c0_i32_0 = arith.constant 0 : i32
    %c0_i32_1 = arith.constant 0 : i32
    return %c0_i32, %c0_i32_0 : i32, i32
  }
  func.func @transform_3(%arg0: i32) -> (i32, i32) {
    %c0_i32 = arith.constant 0 : i32
    %c0_i32_0 = arith.constant 0 : i32
    %c0_i32_1 = arith.constant 0 : i32
    return %c0_i32, %c0_i32_0 : i32, i32
  }
  func.func @transform_4(%arg0: i32) -> (i32, i32) {
    %c0_i32 = arith.constant 0 : i32
    %c0_i32_0 = arith.constant 0 : i32
    %c0_i32_1 = arith.constant 0 : i32
    return %c0_i32, %c0_i32_0 : i32, i32
  }
  func.func @transform_5(%arg0: i32) -> (i32, i32) {
    %c0_i32 = arith.constant 0 : i32
    %c0_i32_0 = arith.constant 0 : i32
    %c0_i32_1 = arith.constant 0 : i32
    return %c0_i32, %c0_i32_0 : i32, i32
  }
  func.func @transform_6(%arg0: i32) -> (i32, i32) {
    %c0_i32 = arith.constant 0 : i32
    %c0_i32_0 = arith.constant 0 : i32
    %c0_i32_1 = arith.constant 0 : i32
    return %c0_i32, %c0_i32_0 : i32, i32
  }
  func.func @transform_7(%arg0: i32) -> (i32, i32) {
    %c0_i32 = arith.constant 0 : i32
    %c0_i32_0 = arith.constant 0 : i32
    %c0_i32_1 = arith.constant 0 : i32
    return %c0_i32, %c0_i32_0 : i32, i32
  }
  func.func @transform_8(%arg0: i32) -> (i32, i32) {
    %c0_i32 = arith.constant 0 : i32
    %c0_i32_0 = arith.constant 0 : i32
    %c0_i32_1 = arith.constant 0 : i32
    return %c0_i32, %c0_i32_0 : i32, i32
  }
  func.func @transform_9(%arg0: i32) -> (i32, i32) {
    %c0_i32 = arith.constant 0 : i32
    %c0_i32_0 = arith.constant 0 : i32
    %c0_i32_1 = arith.constant 0 : i32
    return %c0_i32, %c0_i32_0 : i32, i32
  }
  func.func @transform_10(%arg0: i32) -> (i32, i32) {
    %c0_i32 = arith.constant 0 : i32
    %c0_i32_0 = arith.constant 0 : i32
    %c0_i32_1 = arith.constant 0 : i32
    return %c0_i32, %c0_i32_0 : i32, i32
  }
  func.func @transform_11(%arg0: i32) -> (i32, i32) {
    %c0_i32 = arith.constant 0 : i32
    %c0_i32_0 = arith.constant 0 : i32
    %c0_i32_1 = arith.constant 0 : i32
    return %c0_i32, %c0_i32_0 : i32, i32
  }
  func.func @transform_12(%arg0: i32) -> (i32, i32) {
    %c0_i32 = arith.constant 0 : i32
    %c0_i32_0 = arith.constant 0 : i32
    %c0_i32_1 = arith.constant 0 : i32
    return %c0_i32, %c0_i32_0 : i32, i32
  }
  func.func @transform_13(%arg0: i32) -> (i32, i32) {
    %c0_i32 = arith.constant 0 : i32
    %c0_i32_0 = arith.constant 0 : i32
    %c0_i32_1 = arith.constant 0 : i32
    return %c0_i32, %c0_i32_0 : i32, i32
  }
  func.func @transform_14(%arg0: i32) -> (i32, i32) {
    %c0_i32 = arith.constant 0 : i32
    %c0_i32_0 = arith.constant 0 : i32
    %c0_i32_1 = arith.constant 0 : i32
    return %c0_i32, %c0_i32_0 : i32, i32
  }
}

</mosaic_0001>

<bundles_post_ra>
// kernel: relaxed_cat_ae_forward.1
= control target key start
LH: loop header
LB: loop body
LE: loop exit
PB: predicated region body
PF: predicated region fallthrough
CT: control target
= control target key end

     0   :  { %21 = vsyncpa [#allocation4], 0  ;;  %s1004_s0 = inlined_call_operand.<no memory space> [shape: f32[1], index: 0, kind: input, shape index: {}]   ;;  %s1005_s1 = inlined_call_operand.vmem [shape: f32[8,128], index: 1, kind: input, shape index: {}]   ;;  %s1006_s2 = inlined_call_operand.vmem [shape: bf16[128,128], index: 2, kind: input, shape index: {}]   ;;  %s1007_s3 = inlined_call_operand.vmem [shape: f32[1,128], index: 3, kind: input, shape index: {}]   ;;  %s1008_s4 = inlined_call_operand.vmem [shape: f32[1,128], index: 4, kind: input, shape index: {}]   ;;  %s1009_s5 = inlined_call_operand.vmem [shape: bf16[128,128], index: 5, kind: input, shape index: {}]   ;;  %s1010_s6 = inlined_call_operand.vmem [shape: f32[1,128], index: 6, kind: input, shape index: {}]   ;;  %s1011_s7 = inlined_call_operand.vmem [shape: f32[8,128], index: 7, kind: input, shape index: {}]   ;;  %s1012_s8 = inlined_call_operand.vmem [shape: bf16[128,128], index: 8, kind: input, shape index: {}]   ;;  %s1013_s9 = inlined_call_operand.vmem [shape: f32[1,128], index: 9, kind: input, shape index: {}]   ;;  %s1014_s10 = inlined_call_operand.vmem [shape: f32[1,128], index: 10, kind: input, shape index: {}]   ;;  %s1015_s11 = inlined_call_operand.vmem [shape: bf16[128,128], index: 11, kind: input, shape index: {}]   ;;  %s1016_s12 = inlined_call_operand.vmem [shape: f32[1,128], index: 12, kind: input, shape index: {}]   ;;  %s1017_s13 = inlined_call_operand.hbm [shape: f32[8,128], index: 13, kind: output, shape index: {0}]   ;;  %s1018_s14 = inlined_call_operand.hbm [shape: f32[8,128], index: 14, kind: output, shape index: {1}]  }
   0x1   :  { %v689_v0 = vld [vmem:[%s1006_s2 + $0x38] sm:$0xff]  ;;  %v688_v1 = vld [vmem:[%s1006_s2 + $0x30] sm:$0xff] }
   0x2   :  { %115 = vmatpush.bf16.msra.mxu0 %v689_v0 }
   0x3   :  { %22 = vsyncpa [#allocation6], 0  ;;  %v687_v2 = vld [vmem:[%s1006_s2 + $0x28] sm:$0xff]  ;;  %v686_v3 = vld [vmem:[%s1006_s2 + $0x20] sm:$0xff]  ;;  %v791_v10 = vmov 8.0   ;;  %s792_s28 = smov [#allocation5]  }
   0x4   :  { %v685_v4 = vld [vmem:[%s1006_s2 + $0x18] sm:$0xff]  ;;  %v684_v5 = vld [vmem:[%s1006_s2 + $0x10] sm:$0xff]  ;;  %v683_v6 = vld [vmem:[%s1006_s2 + $0x8] sm:$0xff]  ;;  %721 = vrcp.f32 %v791_v10  ;;  %s535_s29 = sshll.u32 %s792_s28, 4  ;;  %s536_s29 = int_to_ptr.vmem [resolvable:$true] %s535_s29 }
   0x5   :  { %v682_v7 = vld [vmem:[%s1006_s2] sm:$0xff]  ;;  %v697_v15 = vld [vmem:[%s1009_s5 + $0x38] sm:$0xff]  ;;  %v696_v19 = vld [vmem:[%s1009_s5 + $0x30] sm:$0xff] }
   0x6   :  { %116 = vmatpush.bf16.msra.mxu0 %v688_v1  ;;  %v49_v8 = vld [vmem:[%s1005_s1] sm:$0xff]  ;;  %243 = vmatpush.bf16.msra.mxu1 %v697_v15  ;;  %v695_v22 = vld [vmem:[%s1009_s5 + $0x28] sm:$0xff]  ;;  %v693_v30 = vld [vmem:[%s1009_s5 + $0x18] sm:$0xff] }
   0x7   :  { %v50_v9 = vpack.c.bf16 %v49_v8, %v49_v8  ;;  %v694_v27 = vld [vmem:[%s1009_s5 + $0x20] sm:$0xff]  ;;  %v692_v33 = vld [vmem:[%s1009_s5 + $0x10] sm:$0xff]  ;;  %v691_v36 = vld [vmem:[%s1009_s5 + $0x8] sm:$0xff] }
   0x8   :  { %v690_v39 = vld [vmem:[%s1009_s5] sm:$0xff]  ;;  %v705_v59 = vld [vmem:[%s1012_s8 + $0x38] sm:$0xff]  ;;  %v704_v60 = vld [vmem:[%s1012_s8 + $0x30] sm:$0xff] }
   0x9   :  { %v151_v49 = vld [vmem:[%s1007_s3] sm:$0x1]  ;;  %365 = vmatpush.bf16.msra.mxu2 %v705_v59  ;;  %v703_v61 = vld [vmem:[%s1012_s8 + $0x28] sm:$0xff]  ;;  %v701_v63 = vld [vmem:[%s1012_s8 + $0x18] sm:$0xff] }
   0xa   :  { %117 = vmatpush.bf16.msra.mxu0 %v687_v2  ;;  %v722_v11 = vpop.eup %721  ;;  %244 = vmatpush.bf16.msra.mxu1 %v696_v19  ;;  %v717_v54 = vld [vmem:[%s1008_s4] ss:$0 sm:$0xff]  ;;  %v700_v0 = vld [vmem:[%s1012_s8 + $0x10] sm:$0xff]  ;;  %v699_v1 = vld [vmem:[%s1012_s8 + $0x8] sm:$0xff] }
   0xb   :  { %v135_v12 = vmul.f32 8.0, %v722_v11  ;;  %vm139_vm0 = vweird.f32 %v722_v11  ;;  %v702_v62 = vld [vmem:[%s1012_s8 + $0x20] sm:$0xff] }
   0xc   :  { %v718_v2 = vld [vmem:[%s1010_s6] ss:$0 sm:$0xff] }
   0xd   :  { %v136_v13 = vsub.f32 1.0, %v135_v12  ;;  %366 = vmatpush.bf16.msra.mxu2 %v704_v60 }
   0xe   :  { %118 = vmatpush.bf16.msra.mxu0 %v686_v3  ;;  %245 = vmatpush.bf16.msra.mxu1 %v695_v22  ;;  %v698_v3 = vld [vmem:[%s1012_s8] sm:$0xff] }
   0xf   :  { %v137_v17 = vmul.f32 %v722_v11, %v136_v13 }
  0x11   :  { %v138_v21 = vadd.f32 %v722_v11, %v137_v17  ;;  %367 = vmatpush.bf16.msra.mxu2 %v703_v61  ;;  %v706_v61 = vld [vmem:[%s1015_s11] sm:$0xff] }
  0x12   :  { %119 = vmatpush.bf16.msra.mxu0 %v685_v4  ;;  %246 = vmatpush.bf16.msra.mxu1 %v694_v27 }
  0x13   :  { %v905_v26 = vsel %vm139_vm0, %v722_v11, %v138_v21 }
  0x15   :  { %368 = vmatpush.bf16.msra.mxu2 %v702_v62 }
  0x16   :  { %120 = vmatpush.bf16.msra.mxu0 %v684_v5  ;;  %247 = vmatpush.bf16.msra.mxu1 %v693_v30  ;;  %v276_v5 = vld [vmem:[%s1011_s7] sm:$0xff] }
  0x19   :  { %369 = vmatpush.bf16.msra.mxu2 %v701_v63 }
  0x1a   :  { %121 = vmatpush.bf16.msra.mxu0 %v683_v6  ;;  %248 = vmatpush.bf16.msra.mxu1 %v692_v33 }
  0x1d   :  { %370 = vmatpush.bf16.msra.mxu2 %v700_v0 }
  0x1e   :  { %122 = vmatpush.bf16.msra.mxu0 %v682_v7  ;;  %249 = vmatpush.bf16.msra.mxu1 %v691_v36  ;;  %v279_v7 = vstv %s1004_s0 }
  0x21   :  { %123 = vmatmul.bf16.vlgmr.msra.gmra.mxu0 %v50_v9  ;;  %371 = vmatpush.bf16.msra.mxu2 %v699_v1 }
  0x22   :  { %250 = vmatpush.bf16.msra.mxu1 %v690_v39 }
  0x25   :  { %372 = vmatpush.bf16.msra.mxu2 %v698_v3 }
  0x9e   :  { %v124_v14 = vpop.f32.mrf.mxu0 }
  0x9f   :  { %v128_v16 = vrot.slane %v124_v14, 4 }
  0xa1   :  { %v129_v18 = vadd.f32 %v128_v16, %v124_v14 }
  0xa3   :  { %v130_v20 = vrot.slane %v129_v18, 2 }
  0xa5   :  { %v131_v23 = vadd.f32 %v130_v20, %v129_v18 }
  0xa6   :  { %v126_v24 = vpop.f32.mrf.mxu0 }
  0xa7   :  { %v132_v25 = vrot.slane %v131_v23, 1 }
  0xa9   :  { %v133_v28 = vadd.f32 %v132_v25, %v131_v23 }
  0xab   :  { %v141_v29 = vmul.f32 %v905_v26, %v133_v28 }
  0xad   :  { %v142_v31 = vsub.f32 %v124_v14, %v141_v29 }
  0xaf   :  { %v143_v32 = vmul.f32 %v142_v31, %v142_v31 }
  0xb1   :  { %v144_v34 = vrot.slane %v143_v32, 4 }
  0xb3   :  { %v145_v35 = vadd.f32 %v144_v34, %v143_v32 }
  0xb5   :  { %v146_v37 = vrot.slane %v145_v35, 2 }
  0xb7   :  { %v147_v38 = vadd.f32 %v146_v37, %v145_v35 }
  0xb9   :  { %v148_v40 = vrot.slane %v147_v38, 1 }
  0xbb   :  { %v149_v41 = vadd.f32 %v148_v40, %v147_v38  ;;  %v713_v40 = vld [vmem:[%s1015_s11 + $0x38] sm:$0xff] }
  0xbc   :  { %486 = vmatpush.bf16.msra.mxu3 %v713_v40 }
  0xbd   :  { %v150_v42 = vmul.f32 %v149_v41, %v905_v26 }
  0xbf   :  { %v152_v43 = vadd.f32 1e-05, %v150_v42 }
  0xc1   :  { %723 = vrsqrt.f32 %v152_v43  ;;  %vm159_vm2 = vweird.f32 %v152_v43 }
  0xc7   :  { %v724_v44 = vpop.eup %723 }
  0xc8   :  { %v154_v45 = vmul.f32 %v724_v44, %v152_v43  ;;  %vm160_vm1 = vweird.f32 %v724_v44  ;;  %v712_v43 = vld [vmem:[%s1015_s11 + $0x30] sm:$0xff] }
  0xc9   :  { %vm161_vm3 = vmor %vm159_vm2, %vm160_vm1  ;;  %487 = vmatpush.bf16.msra.mxu3 %v712_v43 }
  0xca   :  { %v155_v46 = vmul.f32 %v724_v44, %v154_v45  ;;  %v711_v45 = vld [vmem:[%s1015_s11 + $0x28] sm:$0xff] }
  0xcc   :  { %v156_v47 = vmul.f32 0.5, %v155_v46 }
  0xcd   :  { %488 = vmatpush.bf16.msra.mxu3 %v711_v45 }
  0xce   :  { %v157_v48 = vsub.f32 1.5, %v156_v47 }
  0xd0   :  { %v158_v50 = vmul.f32 %v724_v44, %v157_v48 }
  0xd2   :  { %v162_v51 = vsel %vm161_vm3, %v724_v44, %v158_v50 }
  0xd3   :  { %v163_v52 = vmul.f32 %v162_v51, %v151_v49  ;;  %v710_v49 = vld [vmem:[%s1015_s11 + $0x20] sm:$0xff] }
  0xd4   :  { %489 = vmatpush.bf16.msra.mxu3 %v710_v49 }
  0xd5   :  { %v165_v53 = vperm.slane %v163_v52, 0  ;;  %v709_v52 = vld [vmem:[%s1015_s11 + $0x18] sm:$0xff] }
  0xd7   :  { %v167_v55 = vmul.f32 %v165_v53, %v142_v31 }
  0xd8   :  { %490 = vmatpush.bf16.msra.mxu3 %v709_v52 }
  0xd9   :  { %v172_v56 = vadd.f32 %v717_v54, %v167_v55  ;;  %v708_v55 = vld [vmem:[%s1015_s11 + $0x10] sm:$0xff] }
  0xdb   :  { %v173_v57 = vmax.f32 %v172_v56, 0.0 }
  0xdc   :  { %491 = vmatpush.bf16.msra.mxu3 %v708_v55 }
  0xdd   :  { %v174_v58 = vpack.c.bf16 %v173_v57, %v173_v57 }
  0xdf   :  { %251 = vmatmul.bf16.vlgmr.msra.gmra.mxu1 %v174_v58  ;;  %v707_v58 = vld [vmem:[%s1015_s11 + $0x8] sm:$0xff] }
  0xe0   :  { %492 = vmatpush.bf16.msra.mxu3 %v707_v58 }
  0xe4   :  { %493 = vmatpush.bf16.msra.mxu3 %v706_v61 }
 0x15c   :  { %v252_v4 = vpop.f32.mrf.mxu1 }
 0x15d   :  { %v253_v6 = vadd.f32 %v718_v2, %v252_v4 }
 0x15f   :  { %v615_v8 = vmul.f32 -1.442695, %v253_v6  ;;  %v277_v9 = vadd.f32 %v276_v5, %v253_v6 }
 0x161   :  { %725 = vpow2.f32 %v615_v8  ;;  %v280_v10 = vmul.f32 %v279_v7, %v277_v9  ;;  %v394_v7 = vld [vmem:[%s1013_s9] sm:$0x1]  ;;  %s537_s9 = sshll.u32 %s1018_s14, 4  ;;  %s538_s9 = int_to_ptr.hbm [resolvable:$true] %s537_s9 }
 0x163   :  { %v616_v11 = vmul.f32 -1.442695, %v280_v10 }
 0x164   :  { %v254_v12 = vpop.f32.mrf.mxu1 }
 0x165   :  { %727 = vpow2.f32 %v616_v11 }
 0x167   :  { %v726_v13 = vpop.eup %725 }
 0x168   :  { %v259_v14 = vadd.f32 1.0, %v726_v13 }
 0x16a   :  { %729 = vrcp.f32 %v259_v14  ;;  %v269_v21 = vand.u32 2147483647, %v259_v14  ;;  %v271_v22 = vand.u32 2147483648, %v259_v14  ;;  %vm265_vm5 = vweird.f32 %v259_v14 }
 0x16b   :  { %v728_v15 = vpop.eup %727 }
 0x16c   :  { %v284_v16 = vadd.f32 1.0, %v728_v15  ;;  %vm270_vm7 = vcmp.eq.f32.partialorder %v269_v21, 8.507059e+37  ;;  %v272_v29 = vor.u32 1.1754944e-38, %v271_v22 }
 0x16e   :  { %731 = vrcp.f32 %v284_v16  ;;  %v296_v28 = vand.u32 2147483648, %v284_v16  ;;  %v294_v31 = vand.u32 2147483647, %v284_v16  ;;  %vm290_vm9 = vweird.f32 %v284_v16 }
 0x170   :  { %v730_v17 = vpop.eup %729  ;;  %v297_v35 = vor.u32 1.1754944e-38, %v296_v28  ;;  %vm295_vm11 = vcmp.eq.f32.partialorder %v294_v31, 8.507059e+37 }
 0x171   :  { %v261_v18 = vmul.f32 %v730_v17, %v259_v14  ;;  %vm266_vm4 = vweird.f32 %v730_v17 }
 0x172   :  { %vm267_vm6 = vmor %vm265_vm5, %vm266_vm4 }
 0x173   :  { %v262_v19 = vsub.f32 1.0, %v261_v18 }
 0x174   :  { %v732_v20 = vpop.eup %731 }
 0x175   :  { %v286_v23 = vmul.f32 %v732_v20, %v284_v16  ;;  %v263_v24 = vmul.f32 %v730_v17, %v262_v19  ;;  %vm291_vm8 = vweird.f32 %v732_v20  ;;  %v720_v16 = vld [vmem:[%s1016_s12] ss:$0 sm:$0xff]  ;;  %s526_s12 = sshll.u32 %s1017_s13, 4  ;;  %s527_s12 = int_to_ptr.hbm [resolvable:$true] %s526_s12 }
 0x176   :  { %vm292_vm10 = vmor %vm290_vm9, %vm291_vm8 }
 0x177   :  { %v287_v25 = vsub.f32 1.0, %v286_v23  ;;  %v264_v27 = vadd.f32 %v730_v17, %v263_v24 }
 0x179   :  { %v288_v30 = vmul.f32 %v732_v20, %v287_v25  ;;  %v268_v32 = vsel %vm267_vm6, %v730_v17, %v264_v27 }
 0x17a   :  { %v273_v33 = vsel %vm270_vm7, %v272_v29, %v268_v32 }
 0x17b   :  { %v289_v34 = vadd.f32 %v732_v20, %v288_v30  ;;  %275 = vst [vmem:[#allocation5] sm:$0xff] %v273_v33 }
 0x17c   :  { %540 = dma.vmem_to_hbm [thread:$0]  %s536_s29, 128, %s538_s9, [#allocation6]  }
 0x17d   :  { %v293_v36 = vsel %vm292_vm10, %v732_v20, %v289_v34 }
 0x17e   :  { %v298_v37 = vsel %vm295_vm11, %v297_v35, %v293_v36 }
 0x17f   :  { %v300_v38 = vpack.c.bf16 %v298_v37, %v298_v37 }
 0x181   :  { %373 = vmatmul.bf16.vlgmr.msra.gmra.mxu2 %v300_v38 }
 0x204   :  { %v374_v39 = vpop.f32.mrf.mxu2 }
 0x205   :  { %v378_v41 = vrot.slane %v374_v39, 4 }
 0x207   :  { %v379_v42 = vadd.f32 %v378_v41, %v374_v39 }
 0x209   :  { %v380_v44 = vrot.slane %v379_v42, 2 }
 0x20b   :  { %v381_v46 = vadd.f32 %v380_v44, %v379_v42 }
 0x20c   :  { %v376_v47 = vpop.f32.mrf.mxu2 }
 0x20d   :  { %v382_v48 = vrot.slane %v381_v46, 1 }
 0x20f   :  { %v383_v50 = vadd.f32 %v382_v48, %v381_v46 }
 0x211   :  { %v384_v51 = vmul.f32 %v383_v50, %v905_v26 }
 0x213   :  { %v385_v53 = vsub.f32 %v374_v39, %v384_v51 }
 0x215   :  { %v386_v54 = vmul.f32 %v385_v53, %v385_v53 }
 0x217   :  { %v387_v56 = vrot.slane %v386_v54, 4 }
 0x219   :  { %v388_v57 = vadd.f32 %v387_v56, %v386_v54 }
 0x21b   :  { %v389_v59 = vrot.slane %v388_v57, 2 }
 0x21d   :  { %v390_v60 = vadd.f32 %v389_v59, %v388_v57 }
 0x21f   :  { %v391_v62 = vrot.slane %v390_v60, 1 }
 0x221   :  { %v392_v63 = vadd.f32 %v391_v62, %v390_v60 }
 0x223   :  { %v393_v0 = vmul.f32 %v392_v63, %v905_v26  ;;  %v719_v26 = vld [vmem:[%s1014_s10] ss:$0 sm:$0xff]  ;;  %s793_s10 = smov [#allocation3]  }
 0x224   :  { %s524_s14 = sshll.u32 %s793_s10, 4  ;;  %s525_s14 = int_to_ptr.vmem [resolvable:$true] %s524_s14 }
 0x225   :  { %v395_v1 = vadd.f32 1e-05, %v393_v0 }
 0x227   :  { %733 = vrsqrt.f32 %v395_v1  ;;  %vm402_vm13 = vweird.f32 %v395_v1 }
 0x22d   :  { %v734_v2 = vpop.eup %733 }
 0x22e   :  { %v397_v3 = vmul.f32 %v734_v2, %v395_v1  ;;  %vm403_vm12 = vweird.f32 %v734_v2 }
 0x22f   :  { %vm404_vm14 = vmor %vm402_vm13, %vm403_vm12 }
 0x230   :  { %v398_v4 = vmul.f32 %v734_v2, %v397_v3 }
 0x232   :  { %v399_v5 = vmul.f32 0.5, %v398_v4 }
 0x234   :  { %v400_v6 = vsub.f32 1.5, %v399_v5 }
 0x236   :  { %v401_v8 = vmul.f32 %v734_v2, %v400_v6 }
 0x238   :  { %v405_v9 = vsel %vm404_vm14, %v734_v2, %v401_v8 }
 0x239   :  { %v406_v10 = vmul.f32 %v405_v9, %v394_v7 }
 0x23b   :  { %v408_v11 = vperm.slane %v406_v10, 0 }
 0x23d   :  { %v410_v12 = vmul.f32 %v408_v11, %v385_v53 }
 0x23f   :  { %v415_v13 = vadd.f32 %v719_v26, %v410_v12 }
 0x241   :  { %v416_v14 = vmax.f32 %v415_v13, 0.0 }
 0x243   :  { %v417_v15 = vpack.c.bf16 %v416_v14, %v416_v14 }
 0x245   :  { %494 = vmatmul.bf16.vlgmr.msra.gmra.mxu3 %v417_v15 }
 0x2c8   :  { %v495_v17 = vpop.f32.mrf.mxu3 }
 0x2c9   :  { %v496_v18 = vadd.f32 %v720_v16, %v495_v17 }
 0x2cb   :  { %v681_v19 = vmul.f32 -1.442695, %v496_v18 }
 0x2cd   :  { %735 = vpow2.f32 %v681_v19 }
 0x2d0   :  { %v497_v20 = vpop.f32.mrf.mxu3 }
 0x2d3   :  { %v736_v21 = vpop.eup %735 }
 0x2d4   :  { %v502_v22 = vadd.f32 1.0, %v736_v21 }
 0x2d6   :  { %737 = vrcp.f32 %v502_v22  ;;  %v514_v27 = vand.u32 2147483648, %v502_v22  ;;  %v512_v29 = vand.u32 2147483647, %v502_v22  ;;  %vm508_vm0 = vweird.f32 %v502_v22 }
 0x2d8   :  { %v515_v31 = vor.u32 1.1754944e-38, %v514_v27  ;;  %vm513_vm2 = vcmp.eq.f32.partialorder %v512_v29, 8.507059e+37 }
 0x2dc   :  { %v738_v23 = vpop.eup %737 }
 0x2dd   :  { %v504_v24 = vmul.f32 %v738_v23, %v502_v22  ;;  %vm509_vm15 = vweird.f32 %v738_v23 }
 0x2de   :  { %vm510_vm1 = vmor %vm508_vm0, %vm509_vm15 }
 0x2df   :  { %v505_v25 = vsub.f32 1.0, %v504_v24 }
 0x2e1   :  { %v506_v28 = vmul.f32 %v738_v23, %v505_v25 }
 0x2e3   :  { %v507_v30 = vadd.f32 %v738_v23, %v506_v28 }
 0x2e5   :  { %v511_v32 = vsel %vm510_vm1, %v738_v23, %v507_v30 }
 0x2e6   :  { %v516_v33 = vsel %vm513_vm2, %v515_v31, %v511_v32 }
 0x2e7   :  { %518 = vst [vmem:[#allocation3] sm:$0xff] %v516_v33 }
 0x2e8   :  { %529 = dma.vmem_to_hbm [thread:$0]  %s525_s14, 128, %s527_s12, [#allocation4]  }
 0x2e9   :  { %787 = dma.done.wait [#allocation4], 128  }
 0x2ea   :  { %788 = vsyncadd [#allocation4], 4294967168 }
 0x2eb   :  { %789 = dma.done.wait [#allocation6], 128  }
 0x2ec   :  { %790 = vsyncadd [#allocation6], 4294967168 }
 0x2ed   :  { %549 = vsyncpa [#allocation4], 1 }
 0x2ee   :  { %550 = vsyncpa [#allocation6], 1 }

</bundles_post_ra>
